<compile_context>
chip_gen: v6e
topology: v6e:2x2x1
jax: 0.10.0
libtpu: 0.0.40
codegen_flags: <defaults>
</compile_context>

<pallas_src>
import jax
import jax.numpy as jnp
from jax import lax
from jax.experimental import pallas as pl
from jax.experimental.pallas import tpu as pltpu


def _round_up(x, m):
    return (x + m - 1) // m * m


def _select_tile(B):
    """Pick (tile_b, padded_batch) for the 1-D batch grid.

    tile_b is a multiple of 16 (bf16 sublane packing).  Priorities:
      1) minimize padded rows (wasted 3-layer MXU work + writeback),
      2) prefer >= 2 grid steps so v7x can shard tiles across its 2 TensorCores,
      3) prefer the largest tile (fewer grid steps -> less per-step overhead).
    """
    b16 = _round_up(B, 16)
    if b16 <= 256:
        return b16, b16                                   # single small tile
    cands = (1024, 512, 256, 128) if B >= 4096 else (512, 256, 128)
    best = None
    for t in cands:
        pad = _round_up(B, t)
        steps = pad // t
        key = (pad - B, 0 if steps >= 2 else 1, -t)
        if best is None or key < best[0]:
            best = (key, t, pad)
    return best[1], best[2]


def critic_mlp_kernel(x_ref, w1_ref, b1_ref, w2_ref, b2_ref, w3_ref, b3_ref,
                      out_ref):
    """Fused 3-layer critic MLP on one [TILE_B, D] batch tile.

    x / weights are bf16 (MXU inputs), biases f32; matmuls accumulate in f32 and
    bias-add + ReLU run in f32 on the VPU.  The value head contracts the hidden
    dim directly against a [1, H2] weight row, producing a [1, TILE_B] result
    (batch on lanes) that is stored lane-dense.
    """
    x = x_ref[...]                                               # [TB, D] bf16

    # Layer 1: [TB, D] @ [D, H1] -> f32
    h1 = jnp.dot(x, w1_ref[...], preferred_element_type=jnp.float32)
    h1 = jnp.maximum(h1 + b1_ref[...], 0.0)                      # f32 bias + ReLU

    # Layer 2: [TB, H1] @ [H1, H2] -> f32
    h2 = jnp.dot(h1.astype(jnp.bfloat16), w2_ref[...],
                 preferred_element_type=jnp.float32)
    h2 = jnp.maximum(h2 + b2_ref[...], 0.0)

    # Layer 3 (value head): contract H2 of w3[1, H2] with H2 of h2[TB, H2]
    # -> [1, TB] f32, i.e. the batch lands on the lane axis (lane-dense store).
    v = lax.dot_general(
        w3_ref[...], h2.astype(jnp.bfloat16),
        dimension_numbers=(((1,), (1,)), ((), ())),
        preferred_element_type=jnp.float32)                      # [1, TB]
    out_ref[...] = v + b3_ref[...]                               # + scalar bias


def critic_forward(state, params):
    """Critic forward pass: state [B, D] -> value [B, 1] (float32)."""
    B, D = state.shape
    H1 = params["w1"].shape[1]
    H2 = params["w2"].shape[1]

    tile_b, b_pad = _select_tile(B)
    grid = (b_pad // tile_b,)

    x = state.astype(jnp.bfloat16)
    if b_pad != B:
        x = jnp.pad(x, ((0, b_pad - B), (0, 0)))

    # Weights/biases: constant block index -> fetched once, resident across tiles.
    const = lambda shape: pl.BlockSpec(shape, lambda i: (0, 0))

    out = pl.pallas_call(
        critic_mlp_kernel,
        out_shape=jax.ShapeDtypeStruct((1, b_pad), jnp.float32),
        grid=grid,
        in_specs=[
            pl.BlockSpec((tile_b, D), lambda i: (i, 0)),   # state tile (pipelined)
            const((D, H1)), const((1, H1)),                # W1, b1
            const((H1, H2)), const((1, H2)),               # W2, b2
            const((1, H2)), const((1, 1)),                 # W3 row, b3 scalar
        ],
        out_specs=pl.BlockSpec((1, tile_b), lambda i: (0, i)),
        compiler_params=pltpu.CompilerParams(
            dimension_semantics=("parallel",)),            # v7x: shard across 2 TCs
    )(x, params["w1"], params["b1"], params["w2"], params["b2"],
      params["w3"], params["b3"])

    # Strip batch padding; padded rows hold garbage (bias propagated through
    # ReLUs) and must never be reduced over before this slice.
    return out[0, :B][:, None]


def init_critic_params(key, input_dims, fc1_dims=256, fc2_dims=256):
    """Init mimicking torch.nn.Linear default (uniform +-1/sqrt(fan_in)).

    Weights stored in bf16 (matmul inputs), biases in f32.  The value-head
    weight is stored transposed as a [1, fc2_dims] row vector.
    """
    def linear(key, fan_in, fan_out):
        kw, kb = jax.random.split(key)
        bound = 1.0 / jnp.sqrt(jnp.float32(fan_in))
        w = jax.random.uniform(kw, (fan_in, fan_out), jnp.float32, -bound, bound)
        b = jax.random.uniform(kb, (1, fan_out), jnp.float32, -bound, bound)
        return w.astype(jnp.bfloat16), b

    k1, k2, k3 = jax.random.split(key, 3)
    w1, b1 = linear(k1, input_dims, fc1_dims)
    w2, b2 = linear(k2, fc1_dims, fc2_dims)
    w3, b3 = linear(k3, fc2_dims, 1)
    return {"w1": w1, "b1": b1, "w2": w2, "b2": b2,
            "w3": jnp.transpose(w3), "b3": b3}        # w3: [1, fc2], b3: [1, 1]


def critic_reference(state, params):
    """Pure-JAX reference using the same bf16-weight / f32-accumulate math."""
    x = state.astype(jnp.bfloat16)
    h1 = jnp.maximum(
        jnp.dot(x, params["w1"], preferred_element_type=jnp.float32)
        + params["b1"], 0.0)
    h2 = jnp.maximum(
        jnp.dot(h1.astype(jnp.bfloat16), params["w2"],
                preferred_element_type=jnp.float32) + params["b2"], 0.0)
    v = (jnp.dot(h2.astype(jnp.bfloat16), jnp.transpose(params["w3"]),
                 preferred_element_type=jnp.float32) + params["b3"])
    return v


if __name__ == "__main__":
    key = jax.random.PRNGKey(0)
    k_param, k_state1, k_state2 = jax.random.split(key, 3)

    input_dims = 8          # e.g. LunarLander's 8-dim observation
    fc1_dims = 256
    fc2_dims = 256
    params = init_critic_params(k_param, input_dims, fc1_dims, fc2_dims)

    # Small single-rollout-style batch (single 16-row tile).
    batch = 8
    state = jax.random.normal(k_state1, (batch, input_dims), jnp.float32)
    value = jax.block_until_ready(critic_forward(state, params))
    ref = critic_reference(state, params)
    assert value.shape == (batch, 1)
    assert jnp.allclose(value, ref, atol=1e-2, rtol=1e-2)

    # Awkward PPO-style batch: exercises the tile selection (128-row tiles,
    # padded 600 -> 640, 5 grid steps) and the multi-tile lane-dense output path.
    batch2 = 600
    state2 = jax.random.normal(k_state2, (batch2, input_dims), jnp.float32)
    value2 = jax.block_until_ready(critic_forward(state2, params))
    ref2 = critic_reference(state2, params)
    assert value2.shape == (batch2, 1)
    assert jnp.allclose(value2, ref2, atol=1e-2, rtol=1e-2)

    # TODO(synk): Adam optimizer / checkpoint save-load from the PyTorch module are
    # host-side training utilities, not part of the forward pass.
    print("KERNEL_OK")
</pallas_src>

<mosaic_0001>
module attributes {stable_mosaic.version = 11 : i64} {
  func.func @critic_mlp_kernel(%arg0: i32, %arg1: memref<16x8xbf16, #tpu.memory_space<vmem>>, %arg2: memref<8x256xbf16, #tpu.memory_space<vmem>>, %arg3: memref<1x256xf32, #tpu.memory_space<vmem>>, %arg4: memref<256x256xbf16, #tpu.memory_space<vmem>>, %arg5: memref<1x256xf32, #tpu.memory_space<vmem>>, %arg6: memref<1x256xbf16, #tpu.memory_space<vmem>>, %arg7: memref<1x1xf32, #tpu.memory_space<vmem>>, %arg8: memref<1x16xf32, #tpu.memory_space<vmem>>) attributes {dimension_semantics = [#tpu.dimension_semantics<parallel>], iteration_bounds = array<i64: 1>, scalar_prefetch = 0 : i64, scratch_operands = 0 : i64, tpu.core_type = #tpu.core_type<tc>, window_params = [{transform_indices = @transform_0, window_bounds = array<i64: 16, 8>}, {pipeline_mode = #tpu.pipeline_mode<synchronous>, transform_indices = @transform_1, window_bounds = array<i64: 8, 256>}, {pipeline_mode = #tpu.pipeline_mode<synchronous>, transform_indices = @transform_2, window_bounds = array<i64: 1, 256>}, {pipeline_mode = #tpu.pipeline_mode<synchronous>, transform_indices = @transform_3, window_bounds = array<i64: 256, 256>}, {pipeline_mode = #tpu.pipeline_mode<synchronous>, transform_indices = @transform_4, window_bounds = array<i64: 1, 256>}, {pipeline_mode = #tpu.pipeline_mode<synchronous>, transform_indices = @transform_5, window_bounds = array<i64: 1, 256>}, {pipeline_mode = #tpu.pipeline_mode<synchronous>, transform_indices = @transform_6, window_bounds = array<i64: 1, 1>}, {transform_indices = @transform_7, window_bounds = array<i64: 1, 16>}]} {
    %c0 = arith.constant 0 : index
    %c0_0 = arith.constant 0 : index
    %0 = vector.load %arg1[%c0, %c0_0] : memref<16x8xbf16, #tpu.memory_space<vmem>>, vector<16x8xbf16>
    %c0_1 = arith.constant 0 : index
    %c0_2 = arith.constant 0 : index
    %1 = vector.load %arg2[%c0_1, %c0_2] : memref<8x256xbf16, #tpu.memory_space<vmem>>, vector<8x256xbf16>
    %cst = arith.constant dense<0.000000e+00> : vector<16x256xf32>
    %2 = tpu.matmul %0, %1, %cst {dimension_numbers = #tpu.dot_dimension_numbers<[1], [0], [0], [1], [0, 0, 1, 1], [], []>} : vector<16x8xbf16>, vector<8x256xbf16>, vector<16x256xf32> -> vector<16x256xf32>
    %c0_3 = arith.constant 0 : index
    %c0_4 = arith.constant 0 : index
    %3 = vector.load %arg3[%c0_3, %c0_4] : memref<1x256xf32, #tpu.memory_space<vmem>>, vector<1x256xf32>
    %4 = vector.broadcast %3 : vector<1x256xf32> to vector<16x256xf32>
    %5 = arith.addf %2, %4 : vector<16x256xf32>
    %cst_5 = arith.constant 0.000000e+00 : f32
    %6 = vector.broadcast %cst_5 : f32 to vector<16x256xf32>
    %7 = arith.maximumf %5, %6 : vector<16x256xf32>
    %8 = arith.truncf %7 : vector<16x256xf32> to vector<16x256xbf16>
    %c0_6 = arith.constant 0 : index
    %c0_7 = arith.constant 0 : index
    %9 = vector.load %arg4[%c0_6, %c0_7] : memref<256x256xbf16, #tpu.memory_space<vmem>>, vector<256x256xbf16>
    %cst_8 = arith.constant dense<0.000000e+00> : vector<16x256xf32>
    %10 = tpu.matmul %8, %9, %cst_8 {dimension_numbers = #tpu.dot_dimension_numbers<[1], [0], [0], [1], [0, 0, 1, 1], [], []>} : vector<16x256xbf16>, vector<256x256xbf16>, vector<16x256xf32> -> vector<16x256xf32>
    %c0_9 = arith.constant 0 : index
    %c0_10 = arith.constant 0 : index
    %11 = vector.load %arg5[%c0_9, %c0_10] : memref<1x256xf32, #tpu.memory_space<vmem>>, vector<1x256xf32>
    %12 = vector.broadcast %11 : vector<1x256xf32> to vector<16x256xf32>
    %13 = arith.addf %10, %12 : vector<16x256xf32>
    %cst_11 = arith.constant 0.000000e+00 : f32
    %14 = vector.broadcast %cst_11 : f32 to vector<16x256xf32>
    %15 = arith.maximumf %13, %14 : vector<16x256xf32>
    %c0_12 = arith.constant 0 : index
    %c0_13 = arith.constant 0 : index
    %16 = vector.load %arg6[%c0_12, %c0_13] : memref<1x256xbf16, #tpu.memory_space<vmem>>, vector<1x256xbf16>
    %17 = arith.truncf %15 : vector<16x256xf32> to vector<16x256xbf16>
    %cst_14 = arith.constant dense<0.000000e+00> : vector<1x16xf32>
    %18 = tpu.matmul %16, %17, %cst_14 {dimension_numbers = #tpu.dot_dimension_numbers<[1], [1], [0], [0], [0, 0, 1, 0], [], []>} : vector<1x256xbf16>, vector<16x256xbf16>, vector<1x16xf32> -> vector<1x16xf32>
    %c0_15 = arith.constant 0 : index
    %c0_16 = arith.constant 0 : index
    %19 = vector.load %arg7[%c0_15, %c0_16] : memref<1x1xf32, #tpu.memory_space<vmem>>, vector<1x1xf32>
    %20 = vector.broadcast %19 : vector<1x1xf32> to vector<1x16xf32>
    %21 = arith.addf %18, %20 : vector<1x16xf32>
    %c0_17 = arith.constant 0 : index
    %c0_18 = arith.constant 0 : index
    %22 = vector.load %arg8[%c0_17, %c0_18] : memref<1x16xf32, #tpu.memory_space<vmem>>, vector<1x16xf32>
    tpu.vector_store %arg8[%c0_17, %c0_18], %21 {strides = array<i32>} : memref<1x16xf32, #tpu.memory_space<vmem>>, vector<1x16xf32>,
    return
  }
  func.func @transform_0(%arg0: i32) -> (i32, i32) {
    %c0_i32 = arith.constant 0 : i32
    %c0_i32_0 = arith.constant 0 : i32
    return %arg0, %c0_i32 : i32, i32
  }
  func.func @transform_1(%arg0: i32) -> (i32, i32) {
    %c0_i32 = arith.constant 0 : i32
    %c0_i32_0 = arith.constant 0 : i32
    %c0_i32_1 = arith.constant 0 : i32
    return %c0_i32, %c0_i32_0 : i32, i32
  }
  func.func @transform_2(%arg0: i32) -> (i32, i32) {
    %c0_i32 = arith.constant 0 : i32
    %c0_i32_0 = arith.constant 0 : i32
    %c0_i32_1 = arith.constant 0 : i32
    return %c0_i32, %c0_i32_0 : i32, i32
  }
  func.func @transform_3(%arg0: i32) -> (i32, i32) {
    %c0_i32 = arith.constant 0 : i32
    %c0_i32_0 = arith.constant 0 : i32
    %c0_i32_1 = arith.constant 0 : i32
    return %c0_i32, %c0_i32_0 : i32, i32
  }
  func.func @transform_4(%arg0: i32) -> (i32, i32) {
    %c0_i32 = arith.constant 0 : i32
    %c0_i32_0 = arith.constant 0 : i32
    %c0_i32_1 = arith.constant 0 : i32
    return %c0_i32, %c0_i32_0 : i32, i32
  }
  func.func @transform_5(%arg0: i32) -> (i32, i32) {
    %c0_i32 = arith.constant 0 : i32
    %c0_i32_0 = arith.constant 0 : i32
    %c0_i32_1 = arith.constant 0 : i32
    return %c0_i32, %c0_i32_0 : i32, i32
  }
  func.func @transform_6(%arg0: i32) -> (i32, i32) {
    %c0_i32 = arith.constant 0 : i32
    %c0_i32_0 = arith.constant 0 : i32
    %c0_i32_1 = arith.constant 0 : i32
    return %c0_i32, %c0_i32_0 : i32, i32
  }
  func.func @transform_7(%arg0: i32) -> (i32, i32) {
    %c0_i32 = arith.constant 0 : i32
    %c0_i32_0 = arith.constant 0 : i32
    return %c0_i32, %arg0 : i32, i32
  }
}

</mosaic_0001>

<bundles_post_ra>
// kernel: tpu_custom_call.1
= control target key start
LH: loop header
LB: loop body
LE: loop exit
PB: predicated region body
PF: predicated region fallthrough
CT: control target
= control target key end

     0   :  { %s685_s0 = inlined_call_operand.vmem [shape: bf16[16,8], index: 0, kind: input, shape index: {}]   ;;  %s686_s1 = inlined_call_operand.vmem [shape: bf16[8,256], index: 1, kind: input, shape index: {}]   ;;  %s687_s2 = inlined_call_operand.vmem [shape: f32[1,256], index: 2, kind: input, shape index: {}]   ;;  %s688_s3 = inlined_call_operand.hbm [shape: bf16[256,256], index: 3, kind: input, shape index: {}]   ;;  %s689_s4 = inlined_call_operand.vmem [shape: f32[1,256], index: 4, kind: input, shape index: {}]   ;;  %s690_s5 = inlined_call_operand.vmem [shape: bf16[1,256], index: 5, kind: input, shape index: {}]   ;;  %s691_s6 = inlined_call_operand.<no memory space> [shape: f32[1,1], index: 6, kind: input, shape index: {}]   ;;  %s692_s7 = inlined_call_operand.hbm [shape: f32[1,16], index: 7, kind: output, shape index: {}]  }
   0x1   :  { %v12_v0 = vstv %s691_s6 }
   0x2   :  { %13 = vst [vmem:[#allocation2] sm:$0x1] %v12_v0 }
   0x3   :  { %14 = vsyncpa [#allocation4], 0 }
   0x4   :  { %15 = vsyncpa [#allocation5], 0  ;;  %s615_s26 = smov [#allocation3]  }
   0x5   :  { %s27_s27 = sshll.u32 %s615_s26, 4  ;;  %s28_s27 = int_to_ptr.vmem [resolvable:$true] %s27_s27 }
   0x6   :  { %s579_s28 = scalar_lea.vmem %s28_s27, 4096  ;;  %p584_p1 = scmp.lt.s32.totalorder %s28_s27, %s28_s27 }
   0x7   :  { %p580_p0 = scmp.ne.s32.totalorder %s28_s27, %s579_s28  ;;  %p585_p2 = scmp.lt.s32.totalorder %s579_s28, %s579_s28 }
   0x9   :  { %p586_p3 = por %p585_p2, %p584_p1 }
   0xb   :  { %p587_p4 = pnand %p586_p3, %p580_p0 }
   0xd   :  { %590 = shalt.err (!%p587_p4)
}
   0xe   :  { %s616_s29 = smov 128   ;;  %s617_s30 = smov 8  }
   0xf   :  { %33 = dma.hbm_to_vmem [thread:$0]  %s688_s3, 4096, %s28_s27, [#allocation4], %s616_s29, %s616_s29, %s617_s30  }
  0x10   :  { %611 = dma.done.wait [#allocation4], 4096  }
  0x11   :  { %612 = vsyncadd [#allocation4], 4294963200  ;;  %v618_v1 = vmov 0   ;;  %v46_v2 = vld [vmem:[%s686_s1] sm:$0xff]  ;;  %vm73_vm0 = vcmask 1043456   ;;  %vm69_vm1 = vcmask 64512   ;;  %v49_v39 = vlaneseq }
  0x12   :  { %112 = vmatprep.mubr.bf16.mxu0 %v618_v1  ;;  %519 = vset.pattern.permute.xlu0 %v618_v1  ;;  %v477_v3 = vcombine.high %v46_v2, %v46_v2  ;;  %v476_v4 = vcombine.low %v46_v2, %v46_v2  ;;  %v523_v5 = vld [vmem:[#allocation3 + $0x74] ss:$8 sps:$4 sm:$0xff]   ;;  %v525_v6 = vld [vmem:[#allocation3 + $0x70] ss:$8 sps:$4 sm:$0xff]   ;;  %v526_v9 = vld [vmem:[#allocation3 + $0x64] ss:$8 sps:$4 sm:$0xff]  }
  0x13   :  { %v522_v8 = vld [vmem:[%s685_s0] sm:$0xff]   ;;  %333 = vmatprep.subr.bf16.mxu1 %v523_v5  ;;  %v531_v12 = vld [vmem:[#allocation3 + $0x50] ss:$8 sps:$4 sm:$0xff]   ;;  %v50_v40 = vshrl.u32 %v49_v39, 7  ;;  %v619_v60 = vmov 1966171168  }
  0x14   :  { %478 = vmatprep.subr.msk.bf16.mxu0 %vm73_vm0, %v477_v3  ;;  %v75_v7 = vsel %vm73_vm0, %v476_v4, 0  ;;  %334 = vmatpush1.bf16.msra.mxu1 %v525_v6  ;;  %v528_v10 = vld [vmem:[#allocation3 + $0x60] ss:$8 sps:$4 sm:$0xff]   ;;  %v529_v11 = vld [vmem:[#allocation3 + $0x54] ss:$8 sps:$4 sm:$0xff]   ;;  %v403_v61 = vunpack.c.l.s4 %v619_v60  ;;  %vm458_vm2 = vcmask 122880  }
  0x15   :  { %95 = vmatpush1.bf16.msra.mxu0 %v75_v7  ;;  %335 = vmatprep.subr.bf16.mxu1 %v526_v9  ;;  %v532_v13 = vld [vmem:[#allocation3 + $0x44] ss:$8 sps:$4 sm:$0xff]   ;;  %v534_v14 = vld [vmem:[#allocation3 + $0x40] ss:$8 sps:$4 sm:$0xff]   ;;  %v535_v15 = vld [vmem:[#allocation3 + $0x34] ss:$8 sps:$4 sm:$0xff]  }
  0x16   :  { %v537_v16 = vld [vmem:[#allocation3 + $0x30] ss:$8 sps:$4 sm:$0xff]   ;;  %v538_v17 = vld [vmem:[#allocation3 + $0x24] ss:$8 sps:$4 sm:$0xff]   ;;  %v540_v18 = vld [vmem:[#allocation3 + $0x20] ss:$8 sps:$4 sm:$0xff]   ;;  %v404_v63 = vunpack.c.0.s8 %v403_v61 }
  0x17   :  { %v541_v19 = vld [vmem:[#allocation3 + $0x14] ss:$8 sps:$4 sm:$0xff]   ;;  %v543_v20 = vld [vmem:[#allocation3 + $0x10] ss:$8 sps:$4 sm:$0xff]   ;;  %v544_v21 = vld [vmem:[#allocation3 + $0x4] ss:$8 sps:$4 sm:$0xff]  }
  0x18   :  { %479 = vmatmul.mubr.msk.bf16.vlgmr.msra.gmra.mxu0 %vm69_vm1, %v522_v8  ;;  %336 = vmatpush1.bf16.msra.mxu1 %v528_v10  ;;  %v546_v22 = vld [vmem:[#allocation3] ss:$8 sps:$4 sm:$0xff]   ;;  %v547_v23 = vld [vmem:[#allocation3 + $0xf4] ss:$8 sps:$4 sm:$0xff]   ;;  %v549_v24 = vld [vmem:[#allocation3 + $0xf0] ss:$8 sps:$4 sm:$0xff]   ;;  %v407_v1 = vsub.s32 %v404_v63, %v50_v40 }
  0x19   :  { %337 = vmatprep.subr.bf16.mxu1 %v529_v11  ;;  %v550_v25 = vld [vmem:[#allocation3 + $0xe4] ss:$8 sps:$4 sm:$0xff]   ;;  %v552_v26 = vld [vmem:[#allocation3 + $0xe0] ss:$8 sps:$4 sm:$0xff]   ;;  %v553_v27 = vld [vmem:[#allocation3 + $0xd4] ss:$8 sps:$4 sm:$0xff]  }
  0x1a   :  { %v555_v28 = vld [vmem:[#allocation3 + $0xd0] ss:$8 sps:$4 sm:$0xff]   ;;  %v556_v29 = vld [vmem:[#allocation3 + $0xc4] ss:$8 sps:$4 sm:$0xff]   ;;  %v558_v30 = vld [vmem:[#allocation3 + $0xc0] ss:$8 sps:$4 sm:$0xff]  }
  0x1b   :  { %v559_v31 = vld [vmem:[#allocation3 + $0xb4] ss:$8 sps:$4 sm:$0xff]   ;;  %v561_v32 = vld [vmem:[#allocation3 + $0xb0] ss:$8 sps:$4 sm:$0xff]   ;;  %v562_v33 = vld [vmem:[#allocation3 + $0xa4] ss:$8 sps:$4 sm:$0xff]  }
  0x1c   :  { %338 = vmatpush1.bf16.msra.mxu1 %v531_v12  ;;  %v564_v34 = vld [vmem:[#allocation3 + $0xa0] ss:$8 sps:$4 sm:$0xff]   ;;  %v565_v35 = vld [vmem:[#allocation3 + $0x94] ss:$8 sps:$4 sm:$0xff]   ;;  %v567_v36 = vld [vmem:[#allocation3 + $0x90] ss:$8 sps:$4 sm:$0xff]  }
  0x1d   :  { %339 = vmatprep.subr.bf16.mxu1 %v532_v13  ;;  %v568_v37 = vld [vmem:[#allocation3 + $0x84] ss:$8 sps:$4 sm:$0xff]   ;;  %v570_v38 = vld [vmem:[#allocation3 + $0x80] ss:$8 sps:$4 sm:$0xff]   ;;  %v55_v41 = vsub.s32 1, %v50_v40  ;;  %v51_v42 = vsub.s32 0, %v50_v40 }
  0x1e   :  { %v47_v43 = vld [vmem:[%s687_s2] sm:$0x3] }
  0x1f   :  { %v56_v45 = vrot.slane %v47_v43, %v55_v41  ;;  %v52_v46 = vrot.slane %v47_v43, %v51_v42  ;;  %v512_v62 = vld.sshfl [vmem:[%s690_s5] sm:$0x11 pattern:$0x75316420] }
  0x20   :  { %340 = vmatpush1.bf16.msra.mxu1 %v534_v14  ;;  %v401_v0 = vcombine.high %v512_v62, %v512_v62  ;;  %v408_v3 = vrot.slane %v512_v62, %v407_v1  ;;  %v383_v4 = vld [vmem:[#allocation2] sm:$0x1] }
  0x21   :  { %341 = vmatprep.subr.bf16.mxu1 %v535_v15  ;;  %386 = vperm.xlu0 %519, %v383_v4   ;;  %v161_v5 = vld [vmem:[%s689_s4] sm:$0x3]  ;;  %s620_s4 = smov [#allocation6]  }
  0x22   :  { %v415_v2 = vrot.slane %v401_v0, %v407_v1  ;;  %v170_v7 = vrot.slane %v161_v5, %v55_v41  ;;  %v166_v8 = vrot.slane %v161_v5, %v51_v42  ;;  %s466_s5 = sshll.u32 %s620_s4, 4  ;;  %s467_s5 = int_to_ptr.vmem [resolvable:$true] %s466_s5 }
  0x23   :  { %s591_s15 = scalar_lea.vmem %s467_s5, 16  ;;  %s595_s16 = scalar_lea.vmem %s467_s5, 32 }
  0x24   :  { %342 = vmatpush1.bf16.msra.mxu1 %v537_v16  ;;  %450 = vmatprep.mubr.bf16.mxu0 %v415_v2  ;;  %p592_p5 = scmp.ne.s32.totalorder %s467_s5, %s591_s15  ;;  %p596_p6 = scmp.lt.s32.totalorder %s467_s5, %s467_s5 }
  0x25   :  { %343 = vmatprep.subr.bf16.mxu1 %v538_v17  ;;  %p597_p7 = scmp.lt.s32.totalorder %s595_s16, %s591_s15 }
  0x27   :  { %p598_p8 = por %p597_p7, %p596_p6 }
  0x28   :  { %344 = vmatpush1.bf16.msra.mxu1 %v540_v18 }
  0x29   :  { %345 = vmatprep.subr.bf16.mxu1 %v541_v19  ;;  %p599_p9 = pnand %p598_p8, %p592_p5 }
  0x2c   :  { %346 = vmatpush1.bf16.msra.mxu1 %v543_v20 }
  0x2d   :  { %347 = vmatprep.subr.bf16.mxu1 %v544_v21 }
  0x30   :  { %348 = vmatpush1.bf16.msra.mxu1 %v546_v22 }
  0x31   :  { %349 = vmatprep.subr.bf16.mxu1 %v547_v23 }
  0x34   :  { %350 = vmatpush2.bf16.msra.mxu1 %v549_v24 }
  0x35   :  { %351 = vmatprep.subr.bf16.mxu1 %v550_v25 }
  0x38   :  { %352 = vmatpush2.bf16.msra.mxu1 %v552_v26 }
  0x39   :  { %353 = vmatprep.subr.bf16.mxu1 %v553_v27 }
  0x3c   :  { %354 = vmatpush2.bf16.msra.mxu1 %v555_v28 }
  0x3d   :  { %355 = vmatprep.subr.bf16.mxu1 %v556_v29 }
  0x40   :  { %356 = vmatpush2.bf16.msra.mxu1 %v558_v30 }
  0x41   :  { %357 = vmatprep.subr.bf16.mxu1 %v559_v31 }
  0x44   :  { %358 = vmatpush2.bf16.msra.mxu1 %v561_v32 }
  0x45   :  { %359 = vmatprep.subr.bf16.mxu1 %v562_v33 }
  0x48   :  { %360 = vmatpush2.bf16.msra.mxu1 %v564_v34 }
  0x49   :  { %361 = vmatprep.subr.bf16.mxu1 %v565_v35 }
  0x4c   :  { %362 = vmatpush2.bf16.msra.mxu1 %v567_v36 }
  0x4d   :  { %363 = vmatprep.subr.bf16.mxu1 %v568_v37 }
  0x50   :  { %364 = vmatpush2.bf16.msra.mxu1 %v570_v38 }
  0x9c   :  { %v387_v22 = vpop.permute.xlu0 %386 }
  0x9d   :  { %v392_v23 = vrot.slane %v387_v22, %v51_v42 }
  0xd8   :  { %v114_v44 = vpop.f32.mrf.mxu0 }
  0xd9   :  { %v115_v51 = vadd.f32 %v114_v44, %v52_v46 }
  0xda   :  { %v116_v47 = vpop.f32.mrf.mxu0 }
  0xdb   :  { %v117_v49 = vadd.f32 %v116_v47, %v56_v45  ;;  %v123_v57 = vmax.f32 %v115_v51, 0.0 }
  0xdc   :  { %v118_v48 = vpop.f32.mrf.mxu0 }
  0xdd   :  { %v119_v50 = vadd.f32 %v118_v48, %v52_v46  ;;  %v124_v55 = vmax.f32 %v117_v49, 0.0 }
  0xde   :  { %v120_v52 = vpop.f32.mrf.mxu0 }
  0xdf   :  { %v121_v53 = vadd.f32 %v120_v52, %v56_v45  ;;  %v125_v54 = vmax.f32 %v119_v50, 0.0 }
  0xe1   :  { %v126_v56 = vmax.f32 %v121_v53, 0.0  ;;  %v127_v59 = vpack.c.bf16 %v125_v54, %v123_v57 }
  0xe3   :  { %v128_v58 = vpack.c.bf16 %v126_v56, %v124_v55 }
  0xe5   :  { %365 = vmatprep.mubr.bf16.mxu1 %v128_v58 }
  0xe6   :  { %366 = vmatmul.mubr.bf16.vlgmr.msra.gmra.mxu1 %v127_v59 }
 0x1a6   :  { %v367_v6 = vpop.f32.mrf.mxu1 }
 0x1a7   :  { %v368_v13 = vadd.f32 %v367_v6, %v166_v8 }
 0x1a8   :  { %v369_v9 = vpop.f32.mrf.mxu1 }
 0x1a9   :  { %v370_v11 = vadd.f32 %v369_v9, %v170_v7  ;;  %v376_v19 = vmax.f32 %v368_v13, 0.0 }
 0x1aa   :  { %v371_v10 = vpop.f32.mrf.mxu1 }
 0x1ab   :  { %v372_v12 = vadd.f32 %v371_v10, %v166_v8  ;;  %v377_v17 = vmax.f32 %v370_v11, 0.0 }
 0x1ac   :  { %v373_v14 = vpop.f32.mrf.mxu1 }
 0x1ad   :  { %v374_v15 = vadd.f32 %v373_v14, %v170_v7  ;;  %v378_v16 = vmax.f32 %v372_v12, 0.0 }
 0x1af   :  { %v379_v18 = vmax.f32 %v374_v15, 0.0  ;;  %v381_v21 = vpack.c.bf16 %v378_v16, %v376_v19 }
 0x1b1   :  { %v382_v20 = vpack.c.bf16 %v379_v18, %v377_v17 }
 0x1b3   :  { %432 = vmatprep.subr.bf16.mxu0 %v382_v20 }
 0x1b4   :  { %433 = vmatpush1.bf16.xpose.msra.mxu0 %v381_v21 }
 0x1bb   :  { %451 = vmatmul.mubr.bf16.vlgmr.msra.gmra.mxu0 %v408_v3 }
 0x27b   :  { %v452_v24 = vpop.f32.mrf.mxu0 }
 0x27c   :  { %v453_v25 = vadd.f32 %v452_v24, %v392_v23 }
 0x27d   :  { %v454_v26 = vpop.f32.mrf.mxu0 }
 0x27e   :  { %459 = vst.msk [vmem:[#allocation6] sm:$0x1] %vm458_vm2, %v453_v25 }
 0x27f   :  { %v455_v27 = vpop.f32.mrf.mxu0 }
 0x280   :  { %602 = shalt.err (!%p599_p9)
}
 0x281   :  { %469 = dma.vmem_to_hbm [thread:$0]  %s467_s5, 16, %s692_s7, [#allocation5]   ;;  %v456_v28 = vpop.f32.mrf.mxu0 }
 0x282   :  { %613 = dma.done.wait [#allocation5], 16  }
 0x283   :  { %614 = vsyncadd [#allocation5], 4294967280 }
 0x284   :  { %473 = vsyncpa [#allocation4], 1 }
 0x285   :  { %474 = vsyncpa [#allocation5], 1 }

</bundles_post_ra>
